<compile_context>
chip_gen: v5e
topology: v5e:2x2
jax: 0.10.0
libtpu: 0.0.40
codegen_flags: <defaults>
</compile_context>

<pallas_src>
import functools

import jax
import jax.numpy as jnp
from jax import lax
from jax.experimental import pallas as pl
from jax.experimental.pallas import tpu as pltpu


def _hinge_kernel(n_ref, out_ref, tgt_ref, part_ref, *, strip):
    """One grid step: (tm,128) tiles of scores/targets -> (1,8,128) partial SSQ."""
    tm = out_ref.shape[0]
    nstrips = tm // strip
    base = pl.program_id(0) * (tm * 128)      # flat index of this block's 1st element
    limit = n_ref[0] - base                   # number of valid elements in this block

    # Flat element index within a strip; hoisted (built exactly once — JAX does
    # not CSE broadcast_in_dim).
    idx = (lax.broadcasted_iota(jnp.int32, (strip, 128), 0) * 128
           + lax.broadcasted_iota(jnp.int32, (strip, 128), 1))

    acc = jnp.zeros((8, 128), jnp.float32)
    # nstrips is a small static int (<= 32); full unroll with concrete,
    # 8-row-aligned slice starts keeps every load a clean vreg-aligned access.
    for k in range(nstrips):
        r0 = k * strip
        o = out_ref[pl.ds(r0, strip), :]      # (strip,128) f32 SVM scores
        t = tgt_ref[pl.ds(r0, strip), :]      # (strip,128) f32 {0,1} targets
        lab = 2.0 * t - 1.0                   # labels computed in-kernel
        h = jnp.maximum(1.0 - o * lab, 0.0)   # relu(hinge margin)
        # Mask pad / out-of-bounds tail (select, so garbage never leaks).
        h = jnp.where(idx < (limit - r0 * 128), h, 0.0)
        sq = h * h
        # (strip,128) -> (strip//8,8,128) is layout-preserving (rows group in
        # 8s along sublanes), so the fold is pure vreg-wise VPU adds.
        acc = acc + sq.reshape(strip // 8, 8, 128).sum(axis=0)

    part_ref[...] = acc.reshape(1, 8, 128)


def _choose_tiling(rows, tm_max):
    """Pick (block_rows, strip, num_blocks): block_rows % strip == 0, strip % 8 == 0."""
    STRIP = 256                                   # 256x128 f32 = 128 KiB per stream
    tm_max = max(8, (tm_max // 8) * 8)
    if rows <= 2 * STRIP or tm_max <= STRIP:
        # Small problem (or user forced a tiny tile): single-strip blocks.
        tm = min(tm_max, max(8, -(-rows // 8) * 8))
        return tm, tm, -(-rows // tm)
    # Large problem: aim for >= 2 blocks (v7x megacore), capped at tm_max.
    half = -(-rows // 2)
    tm = min(tm_max, max(STRIP, -(-half // STRIP) * STRIP))
    tm = (tm // STRIP) * STRIP
    return tm, STRIP, -(-rows // tm)


def hinge_loss(output, target, *, tm=4096):
    """output: (N,1) SVM scores, target: (N,) in {0,1}.  Returns scalar f32 loss."""
    out_flat = output.reshape(-1).astype(jnp.float32)
    tgt_flat = target.reshape(-1).astype(jnp.float32)
    n = out_flat.shape[0]

    rows = -(-n // 128)                           # cdiv(n, 128)
    pad = rows * 128 - n
    if pad:
        # Only when N % 128 != 0, and only to the next 128 boundary; the
        # in-kernel mask makes the pad values irrelevant.
        out_flat = jnp.pad(out_flat, (0, pad))
        tgt_flat = jnp.pad(tgt_flat, (0, pad))
    out2d = out_flat.reshape(rows, 128)
    tgt2d = tgt_flat.reshape(rows, 128)

    blk_rows, strip, num_blocks = _choose_tiling(rows, tm)
    n_arr = jnp.array([n], dtype=jnp.int32)       # scalar-prefetched into SMEM

    partials = pl.pallas_call(
        functools.partial(_hinge_kernel, strip=strip),
        out_shape=jax.ShapeDtypeStruct((num_blocks, 8, 128), jnp.float32),
        grid_spec=pltpu.PrefetchScalarGridSpec(
            num_scalar_prefetch=1,
            grid=(num_blocks,),
            in_specs=[
                pl.BlockSpec((blk_rows, 128), lambda i, n_ref: (i, 0)),
                pl.BlockSpec((blk_rows, 128), lambda i, n_ref: (i, 0)),
            ],
            out_specs=pl.BlockSpec((1, 8, 128), lambda i, n_ref: (i, 0, 0)),
        ),
        compiler_params=pltpu.CompilerParams(
            dimension_semantics=("parallel",)),   # independent blocks -> 2 TCs on v7x
    )(n_arr, out2d, tgt2d)

    # Single cross-lane reduce + sqrt in the epilogue (tiny XLA op).
    return jnp.sqrt(jnp.sum(partials))


def _reference(output, target):
    labels = 2.0 * target - 1.0
    losses = 1.0 - output.squeeze(1) * labels
    r = jnp.maximum(losses, 0.0)
    return jnp.sqrt(jnp.sum(r * r))


if __name__ == "__main__":
    key = jax.random.PRNGKey(0)
    k1, k2, k3, k4, k5, k6 = jax.random.split(key, 6)

    # Case 1: N not divisible by 128 -> single block, in-kernel tail mask active.
    N1 = 1000
    out1 = jax.random.normal(k1, (N1, 1), dtype=jnp.float32)            # SVM scores
    tgt1 = jax.random.bernoulli(k2, 0.5, (N1,)).astype(jnp.float32)     # {0,1} labels
    loss1 = jax.block_until_ready(hinge_loss(out1, tgt1))
    ref1 = jax.block_until_ready(_reference(out1, tgt1))
    assert jnp.allclose(loss1, ref1, rtol=1e-5, atol=1e-5), (loss1, ref1)

    # Case 2: small forced tile -> multi-block grid + wrapper-side reduction.
    N2 = 4096
    out2 = jax.random.normal(k3, (N2, 1), dtype=jnp.float32)
    tgt2 = jax.random.bernoulli(k4, 0.5, (N2,)).astype(jnp.float32)
    loss2 = jax.block_until_ready(hinge_loss(out2, tgt2, tm=16))
    ref2 = jax.block_until_ready(_reference(out2, tgt2))
    assert jnp.allclose(loss2, ref2, rtol=1e-5, atol=1e-5), (loss2, ref2)

    # Case 3: larger ragged N -> 2 blocks, multi-strip inner loop, ragged last block.
    N3 = 89601
    out3 = jax.random.normal(k5, (N3, 1), dtype=jnp.float32)
    tgt3 = jax.random.bernoulli(k6, 0.5, (N3,)).astype(jnp.float32)
    loss3 = jax.block_until_ready(hinge_loss(out3, tgt3))
    ref3 = jax.block_until_ready(_reference(out3, tgt3))
    assert jnp.allclose(loss3, ref3, rtol=1e-5, atol=1e-5), (loss3, ref3)

    print("KERNEL_OK")
</pallas_src>

<mosaic_0001>
module attributes {stable_mosaic.version = 11 : i64} {
  func.func @_hinge_kernel(%arg0: i32, %arg1: memref<1xi32, #tpu.memory_space<smem>>, %arg2: memref<8x128xf32, #tpu.memory_space<vmem>>, %arg3: memref<8x128xf32, #tpu.memory_space<vmem>>, %arg4: memref<1x8x128xf32, #tpu.memory_space<vmem>>) attributes {dimension_semantics = [#tpu.dimension_semantics<parallel>], iteration_bounds = array<i64: 1>, scalar_prefetch = 1 : i64, scratch_operands = 0 : i64, tpu.core_type = #tpu.core_type<tc>, window_params = [{transform_indices = @transform_0, window_bounds = array<i64: 8, 128>}, {transform_indices = @transform_1, window_bounds = array<i64: 8, 128>}, {transform_indices = @transform_2, window_bounds = array<i64: 1, 8, 128>}]} {
    %c1024_i32 = arith.constant 1024 : i32
    %0 = arith.muli %arg0, %c1024_i32 : i32
    %c0 = arith.constant 0 : index
    %1 = memref.load %arg1[%c0] : memref<1xi32, #tpu.memory_space<smem>>
    %2 = arith.subi %1, %0 : i32
    %3 = tpu.iota {dimensions = array<i32: 0>} : vector<8x128xi32>
    %c128_i32 = arith.constant 128 : i32
    %4 = vector.broadcast %c128_i32 : i32 to vector<8x128xi32>
    %5 = arith.muli %3, %4 : vector<8x128xi32>
    %6 = tpu.iota {dimensions = array<i32: 1>} : vector<8x128xi32>
    %7 = arith.addi %5, %6 : vector<8x128xi32>
    %cst = arith.constant 0.000000e+00 : f32
    %8 = vector.broadcast %cst : f32 to vector<8x128xf32>
    %c0_0 = arith.constant 0 : index
    %c0_1 = arith.constant 0 : index
    %9 = vector.load %arg2[%c0_0, %c0_1] : memref<8x128xf32, #tpu.memory_space<vmem>>, vector<8x128xf32>
    %c0_2 = arith.constant 0 : index
    %c0_3 = arith.constant 0 : index
    %10 = vector.load %arg3[%c0_2, %c0_3] : memref<8x128xf32, #tpu.memory_space<vmem>>, vector<8x128xf32>
    %cst_4 = arith.constant 2.000000e+00 : f32
    %11 = vector.broadcast %cst_4 : f32 to vector<8x128xf32>
    %12 = arith.mulf %11, %10 : vector<8x128xf32>
    %cst_5 = arith.constant 1.000000e+00 : f32
    %13 = vector.broadcast %cst_5 : f32 to vector<8x128xf32>
    %14 = arith.subf %12, %13 : vector<8x128xf32>
    %15 = arith.mulf %9, %14 : vector<8x128xf32>
    %cst_6 = arith.constant 1.000000e+00 : f32
    %16 = vector.broadcast %cst_6 : f32 to vector<8x128xf32>
    %17 = arith.subf %16, %15 : vector<8x128xf32>
    %cst_7 = arith.constant 0.000000e+00 : f32
    %18 = vector.broadcast %cst_7 : f32 to vector<8x128xf32>
    %19 = arith.maximumf %17, %18 : vector<8x128xf32>
    %c0_i32 = arith.constant 0 : i32
    %20 = arith.subi %2, %c0_i32 : i32
    %21 = vector.broadcast %20 : i32 to vector<8x128xi32>
    %22 = arith.cmpi slt, %7, %21 : vector<8x128xi32>
    %cst_8 = arith.constant 0.000000e+00 : f32
    %23 = vector.broadcast %cst_8 : f32 to vector<8x128xf32>
    %24 = arith.select %22, %19, %23 : vector<8x128xi1>, vector<8x128xf32>
    %25 = arith.mulf %24, %24 : vector<8x128xf32>
    %26 = vector.shape_cast %25 : vector<8x128xf32> to vector<1x8x128xf32>
    %cst_9 = arith.constant dense<0.000000e+00> : vector<8x128xf32>
    %27 = vector.multi_reduction <add>, %26, %cst_9 [0] : vector<1x8x128xf32> to vector<8x128xf32>
    %28 = arith.addf %8, %27 : vector<8x128xf32>
    %29 = vector.shape_cast %28 : vector<8x128xf32> to vector<1x8x128xf32>
    %c0_10 = arith.constant 0 : index
    %c0_11 = arith.constant 0 : index
    %c0_12 = arith.constant 0 : index
    %30 = vector.load %arg4[%c0_10, %c0_11, %c0_12] : memref<1x8x128xf32, #tpu.memory_space<vmem>>, vector<1x8x128xf32>
    tpu.vector_store %arg4[%c0_10, %c0_11, %c0_12], %29 {strides = array<i32>} : memref<1x8x128xf32, #tpu.memory_space<vmem>>, vector<1x8x128xf32>,
    return
  }
  func.func @transform_0(%arg0: i32, %arg1: memref<1xi32, #tpu.memory_space<smem>>) -> (i32, i32) {
    %c0_i32 = arith.constant 0 : i32
    %c0_i32_0 = arith.constant 0 : i32
    return %arg0, %c0_i32 : i32, i32
  }
  func.func @transform_1(%arg0: i32, %arg1: memref<1xi32, #tpu.memory_space<smem>>) -> (i32, i32) {
    %c0_i32 = arith.constant 0 : i32
    %c0_i32_0 = arith.constant 0 : i32
    return %arg0, %c0_i32 : i32, i32
  }
  func.func @transform_2(%arg0: i32, %arg1: memref<1xi32, #tpu.memory_space<smem>>) -> (i32, i32, i32) {
    %c0_i32 = arith.constant 0 : i32
    %c0_i32_0 = arith.constant 0 : i32
    %c0_i32_1 = arith.constant 0 : i32
    return %arg0, %c0_i32, %c0_i32_0 : i32, i32, i32
  }
}

</mosaic_0001>

<bundles_post_ra>
// kernel: tpu_custom_call.1
= control target key start
LH: loop header
LB: loop body
LE: loop exit
PB: predicated region body
PF: predicated region fallthrough
CT: control target
= control target key end

     0   :  { %9 = vsyncpa [#allocation5], 0  ;;  %s200_s0 = inlined_call_operand.<no memory space> [shape: s32[1], index: 0, kind: input, shape index: {}]   ;;  %s201_s1 = inlined_call_operand.hbm [shape: f32[8,128], index: 1, kind: input, shape index: {}]   ;;  %s202_s2 = inlined_call_operand.hbm [shape: f32[8,128], index: 2, kind: input, shape index: {}]   ;;  %s203_s3 = inlined_call_operand.hbm [shape: f32[1,8,128], index: 3, kind: output, shape index: {}]  }
   0x1   :  { %10 = vsyncpa [#allocation8], 0 }
   0x2   :  { %11 = vsyncpa [#allocation6], 0  ;;  %s17_s14 = sshll.u32 %s201_s1, 4  ;;  %s165_s15 = smov [#allocation4]   ;;  %s18_s14 = int_to_ptr.hbm [resolvable:$true] %s17_s14 }
   0x3   :  { %s19_s16 = sshll.u32 %s165_s15, 4  ;;  %s28_s19 = sshll.u32 %s202_s2, 4  ;;  %s20_s16 = int_to_ptr.vmem [resolvable:$true] %s19_s16  ;;  %s29_s19 = int_to_ptr.hbm [resolvable:$true] %s28_s19 }
   0x4   :  { %22 = dma.hbm_to_vmem [thread:$0]  %s18_s14, 128, %s20_s16, [#allocation5]  }
   0x5   :  { %s166_s20 = smov [#allocation7]  }
   0x6   :  { %s30_s21 = sshll.u32 %s166_s20, 4  ;;  %s31_s21 = int_to_ptr.vmem [resolvable:$true] %s30_s21 }
   0x7   :  { %33 = dma.hbm_to_vmem [thread:$0]  %s29_s19, 128, %s31_s21, [#allocation8]  }
   0x8   :  { %159 = dma.done.wait [#allocation5], 128  }
   0x9   :  { %160 = vsyncadd [#allocation5], 4294967168 }
   0xa   :  { %161 = dma.done.wait [#allocation8], 128  }
   0xb   :  { %162 = vsyncadd [#allocation8], 4294967168  ;;  %v45_v0 = vlaneseq  ;;  %v52_v4 = vld [vmem:[#allocation7] sm:$0xff]  ;;  %v51_v6 = vld [vmem:[#allocation4] sm:$0xff]  ;;  %v58_v10 = vstv %s200_s0  ;;  %s167_s22 = smov [#allocation9]   ;;  %s72_s26 = sshll.u32 %s203_s3, 4  ;;  %s73_s26 = int_to_ptr.hbm [resolvable:$true] %s72_s26 }
   0xc   :  { %v53_v5 = vmul.f32 2.0, %v52_v4  ;;  %s70_s23 = sshll.u32 %s167_s22, 4  ;;  %s71_s23 = int_to_ptr.vmem [resolvable:$true] %s70_s23 }
   0xd   :  { %v46_v1 = vshrl.u32 %v45_v0, 7  ;;  %v49_v3 = vand.u32 127, %v45_v0 }
   0xe   :  { %v83_v7 = vadd.f32 -1.0, %v53_v5 }
   0xf   :  { %v47_v2 = vmul.u32 128, %v46_v1 }
  0x10   :  { %v55_v9 = vmul.f32 %v83_v7, %v51_v6 }
  0x11   :  { %v50_v8 = vadd.s32 %v49_v3, %v47_v2 }
  0x12   :  { %v56_v11 = vsub.f32 1.0, %v55_v9 }
  0x13   :  { %vm59_vm0 = vcmp.lt.s32.totalorder %v50_v8, %v58_v10 }
  0x14   :  { %v57_v12 = vmax.f32 %v56_v11, 0.0 }
  0x16   :  { %v60_v13 = vsel %vm59_vm0, %v57_v12, 0.0 }
  0x17   :  { %v61_v14 = vmul.f32 %v60_v13, %v60_v13 }
  0x19   :  { %64 = vst [vmem:[#allocation9] sm:$0xff] %v61_v14 }
  0x1a   :  { %75 = dma.vmem_to_hbm [thread:$0]  %s71_s23, 128, %s73_s26, [#allocation6]  }
  0x1b   :  { %163 = dma.done.wait [#allocation6], 128  }
  0x1c   :  { %164 = vsyncadd [#allocation6], 4294967168 }
  0x1d   :  { %80 = vsyncpa [#allocation5], 1 }
  0x1e   :  { %81 = vsyncpa [#allocation8], 1 }
  0x1f   :  { %82 = vsyncpa [#allocation6], 1 }

</bundles_post_ra>
